<compile_context>
chip_gen: v7x
topology: tpu7x:2x2x1
jax: 0.10.0
libtpu: 0.0.40
codegen_flags: <defaults>
</compile_context>

<pallas_src>
import jax
import jax.numpy as jnp
from jax.experimental import pallas as pl
from jax.experimental.pallas import tpu as pltpu


def _prompt_learner_kernel(x_ref, w1_ref, b1_ref, w2_ref, c_ref, o_ref):
    # x_ref : (Bt, vis_dim)        native dtype (MXU handles bf16/f32 directly)
    # w1_ref: (vis_dim, hidden)    b1_ref: (1, hidden)
    # w2_ref: (hidden, ctx_dim)    c_ref : (1, ctx_dim)   -- b2 (+ ctx if n_ctx==1)
    # o_ref : (Bt, ctx_dim)        lane/sublane-dense output block
    h = jnp.dot(x_ref[...], w1_ref[...], preferred_element_type=jnp.float32)
    h = jnp.maximum(h + b1_ref[...].astype(jnp.float32), 0.0)        # (Bt, hidden)
    h = h.astype(w2_ref.dtype)
    out = jnp.dot(h, w2_ref[...], preferred_element_type=jnp.float32)  # (Bt, ctx_dim)
    out = out + c_ref[...].astype(jnp.float32)
    o_ref[...] = out.astype(o_ref.dtype)                              # unmasked vst


def _round_up(x, m):
    return (x + m - 1) // m * m


def _bias_plus_ctx_2d(im_features, c_vec, w1, b1, w2, *, max_block_b, min_grid_steps):
    """Runs the fused kernel; returns (B, ctx_dim) = meta_net(x) + c_vec."""
    B, vis_dim = im_features.shape
    vis_dim_w, hidden = w1.shape
    hidden_w, ctx_dim = w2.shape
    assert vis_dim == vis_dim_w and hidden == hidden_w
    assert c_vec.shape == (1, ctx_dim)

    # Batch tile: multiple of 8 (sublane aligned), capped by max_block_b.
    max_block_b = max(8, (max_block_b // 8) * 8)
    min_grid_steps = max(1, min_grid_steps)
    if B <= max_block_b and min_grid_steps == 1:
        Bt = B                                           # single block == full array
    else:
        Bt = _round_up(pl.cdiv(B, min_grid_steps), 8)
        Bt = max(8, min(Bt, max_block_b))
    grid = pl.cdiv(B, Bt)                                # ragged last tile masked by Pallas

    b1_2d = b1.reshape(1, hidden)

    return pl.pallas_call(
        _prompt_learner_kernel,
        out_shape=jax.ShapeDtypeStruct((B, ctx_dim), im_features.dtype),
        grid=(grid,),
        in_specs=[
            pl.BlockSpec((Bt, vis_dim), lambda i: (i, 0)),       # activations (tiled on B)
            pl.BlockSpec((vis_dim, hidden), lambda i: (0, 0)),   # W1 (resident)
            pl.BlockSpec((1, hidden), lambda i: (0, 0)),         # b1
            pl.BlockSpec((hidden, ctx_dim), lambda i: (0, 0)),   # W2 (resident)
            pl.BlockSpec((1, ctx_dim), lambda i: (0, 0)),        # b2 (+ ctx)
        ],
        out_specs=pl.BlockSpec((Bt, ctx_dim), lambda i: (i, 0)),  # lane/sublane dense
        compiler_params=pltpu.CompilerParams(
            dimension_semantics=("parallel",)),                   # batch-tile axis
    )(im_features, w1, b1_2d, w2, c_vec)


def prompt_learner_forward(im_features, ctx, w1, b1, w2, b2, *,
                           max_block_b=2048, min_grid_steps=1):
    """Pallas equivalent of PromptLearner.forward(im_features).

    im_features: (B, vis_dim)
    ctx        : (n_ctx, ctx_dim)              (the nn.Parameter self.ctx; module uses n_ctx=1)
    w1, b1     : (vis_dim, hidden), (hidden,)  -- linear1 (x @ W + b convention)
    w2, b2     : (hidden, ctx_dim), (ctx_dim,) -- linear2
    returns    : (B, n_ctx, ctx_dim)

    On v7x with large B, pass min_grid_steps=2 so the parallel batch axis
    shards across both TensorCores.
    """
    B = im_features.shape[0]
    n_ctx, ctx_dim = ctx.shape
    assert w2.shape[1] == ctx_dim and b2.shape == (ctx_dim,)

    if n_ctx == 1:
        # Fold ctx into the output bias: one fewer add / input per tile.
        c_vec = ctx + b2.reshape(1, ctx_dim)
        out2d = _bias_plus_ctx_2d(im_features, c_vec, w1, b1, w2,
                                  max_block_b=max_block_b,
                                  min_grid_steps=min_grid_steps)
        return out2d.reshape(B, 1, ctx_dim)              # metadata-only reshape
    else:
        # General n_ctx (not used by this module): fuse only b2 in-kernel,
        # broadcast-add ctx outside (tiny op relative to the matmuls).
        out2d = _bias_plus_ctx_2d(im_features, b2.reshape(1, ctx_dim), w1, b1, w2,
                                  max_block_b=max_block_b,
                                  min_grid_steps=min_grid_steps)
        return ctx[None, :, :] + out2d[:, None, :]


def prompt_learner_ref(im_features, ctx, w1, b1, w2, b2):
    """Pure-JAX reference mirroring the PyTorch forward line-by-line."""
    h = jnp.maximum(im_features @ w1 + b1, 0.0)
    bias = h @ w2 + b2                          # (B, ctx_dim)
    return ctx[None, :, :] + bias[:, None, :]   # (B, n_ctx, ctx_dim)


if __name__ == "__main__":
    key = jax.random.PRNGKey(0)
    k_ctx, k_x, k_w1, k_b1, k_w2, k_b2 = jax.random.split(key, 6)

    # Shapes implied by the module: ctx is hard-coded (1, 512), so ctx_dim = 512;
    # vis_dim = 512 (CLIP ViT-B/32 output_dim) and hidden = vis_dim // 16 = 32.
    B = 2
    vis_dim = 512
    ctx_dim = 512
    hidden = vis_dim // 16
    dtype = jnp.float32

    ctx = 0.02 * jax.random.normal(k_ctx, (1, ctx_dim), dtype)   # nn.init.normal_(std=0.02)
    im_features = jax.random.normal(k_x, (B, vis_dim), dtype)
    w1 = jax.random.normal(k_w1, (vis_dim, hidden), dtype) / jnp.sqrt(float(vis_dim))
    b1 = 0.01 * jax.random.normal(k_b1, (hidden,), dtype)
    w2 = jax.random.normal(k_w2, (hidden, ctx_dim), dtype) / jnp.sqrt(float(hidden))
    b2 = 0.01 * jax.random.normal(k_b2, (ctx_dim,), dtype)

    out = jax.block_until_ready(
        prompt_learner_forward(im_features, ctx, w1, b1, w2, b2))
    ref = jax.block_until_ready(
        prompt_learner_ref(im_features, ctx, w1, b1, w2, b2))
    assert out.shape == (B, 1, ctx_dim), out.shape
    assert jnp.allclose(out, ref, atol=2e-3, rtol=2e-3), float(
        jnp.max(jnp.abs(out - ref)))

    # Second check: exercise batch tiling with a ragged last tile (no wrapper
    # pad/slice; Pallas masks the partial block).
    B2 = 10
    x2 = jax.random.normal(jax.random.PRNGKey(1), (B2, vis_dim), dtype)
    out2 = jax.block_until_ready(
        prompt_learner_forward(x2, ctx, w1, b1, w2, b2, max_block_b=8))
    ref2 = jax.block_until_ready(
        prompt_learner_ref(x2, ctx, w1, b1, w2, b2))
    assert out2.shape == (B2, 1, ctx_dim), out2.shape
    assert jnp.allclose(out2, ref2, atol=2e-3, rtol=2e-3), float(
        jnp.max(jnp.abs(out2 - ref2)))

    print("KERNEL_OK")
</pallas_src>

<mosaic_0001>
module attributes {stable_mosaic.version = 11 : i64} {
  func.func @_prompt_learner_kernel(%arg0: i32, %arg1: memref<2x512xf32, #tpu.memory_space<vmem>>, %arg2: memref<512x32xf32, #tpu.memory_space<vmem>>, %arg3: memref<1x32xf32, #tpu.memory_space<vmem>>, %arg4: memref<32x512xf32, #tpu.memory_space<vmem>>, %arg5: memref<1x512xf32, #tpu.memory_space<vmem>>, %arg6: memref<2x512xf32, #tpu.memory_space<vmem>>) attributes {dimension_semantics = [#tpu.dimension_semantics<parallel>], iteration_bounds = array<i64: 1>, scalar_prefetch = 0 : i64, scratch_operands = 0 : i64, tpu.core_type = #tpu.core_type<tc>, window_params = [{transform_indices = @transform_0, window_bounds = array<i64: 2, 512>}, {pipeline_mode = #tpu.pipeline_mode<synchronous>, transform_indices = @transform_1, window_bounds = array<i64: 512, 32>}, {pipeline_mode = #tpu.pipeline_mode<synchronous>, transform_indices = @transform_2, window_bounds = array<i64: 1, 32>}, {pipeline_mode = #tpu.pipeline_mode<synchronous>, transform_indices = @transform_3, window_bounds = array<i64: 32, 512>}, {pipeline_mode = #tpu.pipeline_mode<synchronous>, transform_indices = @transform_4, window_bounds = array<i64: 1, 512>}, {transform_indices = @transform_5, window_bounds = array<i64: 2, 512>}]} {
    %c0 = arith.constant 0 : index
    %c0_0 = arith.constant 0 : index
    %0 = vector.load %arg1[%c0, %c0_0] : memref<2x512xf32, #tpu.memory_space<vmem>>, vector<2x512xf32>
    %c0_1 = arith.constant 0 : index
    %c0_2 = arith.constant 0 : index
    %1 = vector.load %arg2[%c0_1, %c0_2] : memref<512x32xf32, #tpu.memory_space<vmem>>, vector<512x32xf32>
    %cst = arith.constant dense<0.000000e+00> : vector<2x32xf32>
    %2 = tpu.matmul %0, %1, %cst {dimension_numbers = #tpu.dot_dimension_numbers<[1], [0], [0], [1], [0, 0, 1, 1], [], []>} : vector<2x512xf32>, vector<512x32xf32>, vector<2x32xf32> -> vector<2x32xf32>
    %c0_3 = arith.constant 0 : index
    %c0_4 = arith.constant 0 : index
    %3 = vector.load %arg3[%c0_3, %c0_4] : memref<1x32xf32, #tpu.memory_space<vmem>>, vector<1x32xf32>
    %4 = vector.broadcast %3 : vector<1x32xf32> to vector<2x32xf32>
    %5 = arith.addf %2, %4 : vector<2x32xf32>
    %cst_5 = arith.constant 0.000000e+00 : f32
    %6 = vector.broadcast %cst_5 : f32 to vector<2x32xf32>
    %7 = arith.maximumf %5, %6 : vector<2x32xf32>
    %c0_6 = arith.constant 0 : index
    %c0_7 = arith.constant 0 : index
    %8 = vector.load %arg4[%c0_6, %c0_7] : memref<32x512xf32, #tpu.memory_space<vmem>>, vector<32x512xf32>
    %cst_8 = arith.constant dense<0.000000e+00> : vector<2x512xf32>
    %9 = tpu.matmul %7, %8, %cst_8 {dimension_numbers = #tpu.dot_dimension_numbers<[1], [0], [0], [1], [0, 0, 1, 1], [], []>} : vector<2x32xf32>, vector<32x512xf32>, vector<2x512xf32> -> vector<2x512xf32>
    %c0_9 = arith.constant 0 : index
    %c0_10 = arith.constant 0 : index
    %10 = vector.load %arg5[%c0_9, %c0_10] : memref<1x512xf32, #tpu.memory_space<vmem>>, vector<1x512xf32>
    %11 = vector.broadcast %10 : vector<1x512xf32> to vector<2x512xf32>
    %12 = arith.addf %9, %11 : vector<2x512xf32>
    %c0_11 = arith.constant 0 : index
    %c0_12 = arith.constant 0 : index
    %13 = vector.load %arg6[%c0_11, %c0_12] : memref<2x512xf32, #tpu.memory_space<vmem>>, vector<2x512xf32>
    tpu.vector_store %arg6[%c0_11, %c0_12], %12 {strides = array<i32>} : memref<2x512xf32, #tpu.memory_space<vmem>>, vector<2x512xf32>,
    return
  }
  func.func @transform_0(%arg0: i32) -> (i32, i32) {
    %c0_i32 = arith.constant 0 : i32
    %c0_i32_0 = arith.constant 0 : i32
    return %arg0, %c0_i32 : i32, i32
  }
  func.func @transform_1(%arg0: i32) -> (i32, i32) {
    %c0_i32 = arith.constant 0 : i32
    %c0_i32_0 = arith.constant 0 : i32
    %c0_i32_1 = arith.constant 0 : i32
    return %c0_i32, %c0_i32_0 : i32, i32
  }
  func.func @transform_2(%arg0: i32) -> (i32, i32) {
    %c0_i32 = arith.constant 0 : i32
    %c0_i32_0 = arith.constant 0 : i32
    %c0_i32_1 = arith.constant 0 : i32
    return %c0_i32, %c0_i32_0 : i32, i32
  }
  func.func @transform_3(%arg0: i32) -> (i32, i32) {
    %c0_i32 = arith.constant 0 : i32
    %c0_i32_0 = arith.constant 0 : i32
    %c0_i32_1 = arith.constant 0 : i32
    return %c0_i32, %c0_i32_0 : i32, i32
  }
  func.func @transform_4(%arg0: i32) -> (i32, i32) {
    %c0_i32 = arith.constant 0 : i32
    %c0_i32_0 = arith.constant 0 : i32
    %c0_i32_1 = arith.constant 0 : i32
    return %c0_i32, %c0_i32_0 : i32, i32
  }
  func.func @transform_5(%arg0: i32) -> (i32, i32) {
    %c0_i32 = arith.constant 0 : i32
    %c0_i32_0 = arith.constant 0 : i32
    return %arg0, %c0_i32 : i32, i32
  }
}

</mosaic_0001>

<bundles_post_ra>
// kernel: tpu_custom_call.1
= control target key start
LH: loop header
LB: loop body
LE: loop exit
PB: predicated region body
PF: predicated region fallthrough
CT: control target
= control target key end

     0   :  { %v658_v47 = vmov 1983009808   ;;  %v98_v49 = vlaneseq  ;;  %s965_s0 = inlined_call_operand.vmem [shape: f32[2,512], index: 0, kind: input, shape index: {}]   ;;  %s966_s1 = inlined_call_operand.vmem [shape: f32[512,32], index: 1, kind: input, shape index: {}]   ;;  %s967_s2 = inlined_call_operand.vmem [shape: f32[1,32], index: 2, kind: input, shape index: {}]   ;;  %s968_s3 = inlined_call_operand.vmem [shape: f32[32,512], index: 3, kind: input, shape index: {}]   ;;  %s969_s4 = inlined_call_operand.vmem [shape: f32[1,512], index: 4, kind: input, shape index: {}]   ;;  %s970_s5 = inlined_call_operand.hbm [shape: f32[2,512], index: 5, kind: output, shape index: {}]  }
   0x1   :  { %v38_v0 = vld [vmem:[%s966_s1 + $0x80] sm:$0xff]  ;;  %v39_v1 = vld [vmem:[%s966_s1 + $0x88] sm:$0xff]  ;;  %v40_v11 = vld [vmem:[%s966_s1 + $0x90] sm:$0xff]  ;;  %v96_v48 = vunpack.c.l.s4 %v658_v47 }
   0x2   :  { %v22_v2 = vld [vmem:[%s966_s1] sm:$0xff]  ;;  %v550_v3 = vpack.c.bf16 %v39_v1, %v38_v0  ;;  %v23_v4 = vld [vmem:[%s966_s1 + $0x8] sm:$0xff]  ;;  %v41_v13 = vld [vmem:[%s966_s1 + $0x98] sm:$0xff]  ;;  %v817_v0 = vshrl.u32 %v98_v49, 7 }
   0x3   :  { %v70_v5 = vld [vmem:[%s966_s1 + $0x180] sm:$0xff]  ;;  %v71_v6 = vld [vmem:[%s966_s1 + $0x188] sm:$0xff]  ;;  %v552_v7 = vpack.c.bf16 %v23_v4, %v22_v2  ;;  %v24_v14 = vld [vmem:[%s966_s1 + $0x10] sm:$0xff]  ;;  %v554_v16 = vpack.c.bf16 %v41_v13, %v40_v11  ;;  %v97_v63 = vunpack.c.0.s8 %v96_v48 }
   0x4   :  { %v582_v8 = vpack.c.bf16 %v71_v6, %v70_v5  ;;  %v54_v9 = vld [vmem:[%s966_s1 + $0x100] sm:$0xff]  ;;  %v55_v10 = vld [vmem:[%s966_s1 + $0x108] sm:$0xff]  ;;  %551 = vmatprep.subr.bf16.mxu0 %v550_v3  ;;  %v25_v15 = vld [vmem:[%s966_s1 + $0x18] sm:$0xff] }
   0x5   :  { %v584_v12 = vpack.c.bf16 %v55_v10, %v54_v9  ;;  %553 = vmatpush3.bf16.msra.mxu0 %v552_v7  ;;  %v556_v17 = vpack.c.bf16 %v25_v15, %v24_v14  ;;  %v72_v18 = vld [vmem:[%s966_s1 + $0x190] sm:$0xff]  ;;  %v73_v19 = vld [vmem:[%s966_s1 + $0x198] sm:$0xff]  ;;  %v42_v23 = vld [vmem:[%s966_s1 + $0xa0] sm:$0xff]  ;;  %v844_v13 = vsub.s32 %v97_v63, %v817_v0 }
   0x6   :  { %583 = vmatprep.subr.bf16.mxu1 %v582_v8  ;;  %v56_v20 = vld [vmem:[%s966_s1 + $0x110] sm:$0xff]  ;;  %v586_v21 = vpack.c.bf16 %v73_v19, %v72_v18  ;;  %v57_v22 = vld [vmem:[%s966_s1 + $0x118] sm:$0xff]  ;;  %v43_v24 = vld [vmem:[%s966_s1 + $0xa8] sm:$0xff]  ;;  %555 = vmatprep.subr.bf16.mxu0 %v554_v16 }
   0x7   :  { %585 = vmatpush3.bf16.msra.mxu1 %v584_v12  ;;  %v588_v25 = vpack.c.bf16 %v57_v22, %v56_v20  ;;  %v558_v26 = vpack.c.bf16 %v43_v24, %v42_v23  ;;  %v26_v27 = vld [vmem:[%s966_s1 + $0x20] sm:$0xff]  ;;  %v27_v28 = vld [vmem:[%s966_s1 + $0x28] sm:$0xff]  ;;  %v44_v35 = vld [vmem:[%s966_s1 + $0xb0] sm:$0xff] }
   0x8   :  { %v74_v29 = vld [vmem:[%s966_s1 + $0x1a0] sm:$0xff]  ;;  %587 = vmatprep.subr.bf16.mxu1 %v586_v21  ;;  %v75_v30 = vld [vmem:[%s966_s1 + $0x1a8] sm:$0xff]  ;;  %v560_v33 = vpack.c.bf16 %v27_v28, %v26_v27  ;;  %v45_v36 = vld [vmem:[%s966_s1 + $0xb8] sm:$0xff] }
   0x9   :  { %v58_v31 = vld [vmem:[%s966_s1 + $0x120] sm:$0xff]  ;;  %v59_v32 = vld [vmem:[%s966_s1 + $0x128] sm:$0xff]  ;;  %557 = vmatpush3.bf16.msra.mxu0 %v556_v17  ;;  %v590_v34 = vpack.c.bf16 %v75_v30, %v74_v29  ;;  %v28_v37 = vld [vmem:[%s966_s1 + $0x30] sm:$0xff]  ;;  %v562_v39 = vpack.c.bf16 %v45_v36, %v44_v35 }
   0xa   :  { %559 = vmatprep.subr.bf16.mxu0 %v558_v26  ;;  %v592_v38 = vpack.c.bf16 %v59_v32, %v58_v31  ;;  %v29_v40 = vld [vmem:[%s966_s1 + $0x38] sm:$0xff]  ;;  %v76_v41 = vld [vmem:[%s966_s1 + $0x1b0] sm:$0xff]  ;;  %v46_v46 = vld [vmem:[%s966_s1 + $0xc0] sm:$0xff] }
   0xb   :  { %589 = vmatpush3.bf16.msra.mxu1 %v588_v25  ;;  %v77_v42 = vld [vmem:[%s966_s1 + $0x1b8] sm:$0xff]  ;;  %v60_v44 = vld [vmem:[%s966_s1 + $0x130] sm:$0xff]  ;;  %v47_v50 = vld [vmem:[%s966_s1 + $0xc8] sm:$0xff]  ;;  %v564_v51 = vpack.c.bf16 %v29_v40, %v28_v37 }
   0xc   :  { %591 = vmatprep.subr.bf16.mxu1 %v590_v34  ;;  %v594_v43 = vpack.c.bf16 %v77_v42, %v76_v41  ;;  %v61_v45 = vld [vmem:[%s966_s1 + $0x138] sm:$0xff]  ;;  %v78_v52 = vld [vmem:[%s966_s1 + $0x1c0] sm:$0xff]  ;;  %v79_v53 = vld [vmem:[%s966_s1 + $0x1c8] sm:$0xff]  ;;  %v566_v55 = vpack.c.bf16 %v47_v50, %v46_v46 }
   0xd   :  { %561 = vmatpush3.bf16.msra.mxu0 %v560_v33  ;;  %v596_v54 = vpack.c.bf16 %v61_v45, %v60_v44  ;;  %v30_v56 = vld [vmem:[%s966_s1 + $0x40] sm:$0xff]  ;;  %v31_v57 = vld [vmem:[%s966_s1 + $0x48] sm:$0xff]  ;;  %v598_v59 = vpack.c.bf16 %v79_v53, %v78_v52  ;;  %v48_v61 = vld [vmem:[%s966_s1 + $0xd0] sm:$0xff] }
   0xe   :  { %563 = vmatprep.subr.bf16.mxu0 %v562_v39  ;;  %v62_v58 = vld [vmem:[%s966_s1 + $0x140] sm:$0xff]  ;;  %v63_v60 = vld [vmem:[%s966_s1 + $0x148] sm:$0xff]  ;;  %v49_v62 = vld [vmem:[%s966_s1 + $0xd8] sm:$0xff]  ;;  %v568_v3 = vpack.c.bf16 %v31_v57, %v30_v56 }
   0xf   :  { %593 = vmatpush3.bf16.msra.mxu1 %v592_v38  ;;  %v80_v1 = vld [vmem:[%s966_s1 + $0x1d0] sm:$0xff]  ;;  %v81_v2 = vld [vmem:[%s966_s1 + $0x1d8] sm:$0xff]  ;;  %v600_v4 = vpack.c.bf16 %v63_v60, %v62_v58  ;;  %v570_v5 = vpack.c.bf16 %v49_v62, %v48_v61  ;;  %v50_v11 = vld [vmem:[%s966_s1 + $0xe0] sm:$0xff] }
  0x10   :  { %595 = vmatprep.subr.bf16.mxu1 %v594_v43  ;;  %v32_v6 = vld [vmem:[%s966_s1 + $0x50] sm:$0xff]  ;;  %v33_v7 = vld [vmem:[%s966_s1 + $0x58] sm:$0xff]  ;;  %v602_v9 = vpack.c.bf16 %v81_v2, %v80_v1  ;;  %v51_v12 = vld [vmem:[%s966_s1 + $0xe8] sm:$0xff] }
  0x11   :  { %565 = vmatpush3.bf16.msra.mxu0 %v564_v51  ;;  %v64_v8 = vld [vmem:[%s966_s1 + $0x150] sm:$0xff]  ;;  %v65_v10 = vld [vmem:[%s966_s1 + $0x158] sm:$0xff]  ;;  %v82_v14 = vld [vmem:[%s966_s1 + $0x1e0] sm:$0xff]  ;;  %v572_v16 = vpack.c.bf16 %v33_v7, %v32_v6  ;;  %v574_v20 = vpack.c.bf16 %v51_v12, %v50_v11 }
  0x12   :  { %567 = vmatprep.subr.bf16.mxu0 %v566_v55  ;;  %v83_v15 = vld [vmem:[%s966_s1 + $0x1e8] sm:$0xff]  ;;  %v34_v17 = vld [vmem:[%s966_s1 + $0x60] sm:$0xff]  ;;  %v604_v19 = vpack.c.bf16 %v65_v10, %v64_v8 }
  0x13   :  { %597 = vmatpush3.bf16.msra.mxu1 %v596_v54  ;;  %v35_v18 = vld [vmem:[%s966_s1 + $0x68] sm:$0xff]  ;;  %v66_v21 = vld [vmem:[%s966_s1 + $0x160] sm:$0xff] }
  0x14   :  { %599 = vmatprep.subr.bf16.mxu1 %v598_v59  ;;  %v21_v22 = vld [vmem:[%s965_s0] sm:$0xff] }
  0x15   :  { %569 = vmatpush3.bf16.msra.mxu0 %v568_v3 }
  0x16   :  { %571 = vmatprep.subr.bf16.mxu0 %v570_v5 }
  0x17   :  { %601 = vmatpush3.bf16.msra.mxu1 %v600_v4 }
  0x18   :  { %10 = vsyncpa [#allocation3], 0  ;;  %603 = vmatprep.subr.bf16.mxu1 %v602_v9  ;;  %v606_v23 = vpack.c.bf16 %v83_v15, %v82_v14  ;;  %v67_v24 = vld [vmem:[%s966_s1 + $0x168] sm:$0xff]  ;;  %v52_v25 = vld [vmem:[%s966_s1 + $0xf0] sm:$0xff]  ;;  %v101_v27 = vrot.slane %v21_v22, %v844_v13  ;;  %v94_v28 = vcombine.high %v21_v22, %v21_v22  ;;  %v576_v31 = vpack.c.bf16 %v35_v18, %v34_v17 }
  0x19   :  { %v53_v26 = vld [vmem:[%s966_s1 + $0xf8] sm:$0xff]  ;;  %v84_v29 = vld [vmem:[%s966_s1 + $0x1f0] sm:$0xff]  ;;  %573 = vmatpush3.bf16.msra.mxu0 %v572_v16  ;;  %v608_v34 = vpack.c.bf16 %v67_v24, %v66_v21  ;;  %v257_v44 = vld [vmem:[%s968_s3 + $0x8] sm:$0xff]  ;;  %v659_v5 = vmov 0.0   ;;  %vm294_vm0 = vcmask 261120   ;;  %v276_v17 = vsub.s32 0, %v817_v0 }
  0x1a   :  { %v85_v30 = vld [vmem:[%s966_s1 + $0x1f8] sm:$0xff]  ;;  %v109_v32 = vcombine.high %v101_v27, %v101_v27  ;;  %v108_v33 = vrot.slane %v94_v28, %v844_v13  ;;  %575 = vmatprep.subr.bf16.mxu0 %v574_v20  ;;  %v578_v35 = vpack.c.bf16 %v53_v26, %v52_v25  ;;  %v36_v36 = vld [vmem:[%s966_s1 + $0x70] sm:$0xff]  ;;  %v261_v45 = vld [vmem:[%s968_s3 + $0x28] sm:$0xff]  ;;  %v284_v18 = vsub.s32 2, %v817_v0 }
  0x1b   :  { %605 = vmatpush3.bf16.msra.mxu1 %v604_v19  ;;  %v37_v37 = vld [vmem:[%s966_s1 + $0x78] sm:$0xff]  ;;  %v610_v38 = vpack.c.bf16 %v85_v30, %v84_v29  ;;  %v68_v39 = vld [vmem:[%s966_s1 + $0x170] sm:$0xff]  ;;  %v614_v47 = vpack.c.bf16 %v261_v45, %v257_v44  ;;  %v256_v49 = vld [vmem:[%s968_s3] sm:$0xff]  ;;  %v280_v20 = vsub.s32 1, %v817_v0  ;;  %v288_v21 = vsub.s32 3, %v817_v0 }
  0x1c   :  { %607 = vmatprep.subr.bf16.mxu1 %v606_v23  ;;  %v69_v40 = vld [vmem:[%s966_s1 + $0x178] sm:$0xff]  ;;  %179 = vmatprep.mubr.f32.mxu0 %v109_v32  ;;  %v110_v41 = vcombine.high %v108_v33, %v108_v33  ;;  %v580_v42 = vpack.c.bf16 %v37_v37, %v36_v36  ;;  %v260_v51 = vld [vmem:[%s968_s3 + $0x20] sm:$0xff]  ;;  %v258_v52 = vld [vmem:[%s968_s3 + $0x10] sm:$0xff] }
  0x1d   :  { %577 = vmatpush3.bf16.msra.mxu0 %v576_v31  ;;  %v612_v43 = vpack.c.bf16 %v69_v40, %v68_v39  ;;  %v259_v46 = vld [vmem:[%s968_s3 + $0x18] sm:$0xff]  ;;  %v262_v53 = vld [vmem:[%s968_s3 + $0x30] sm:$0xff]  ;;  %v616_v54 = vpack.c.bf16 %v260_v51, %v256_v49  ;;  %v265_v56 = vld [vmem:[%s968_s3 + $0x48] sm:$0xff] }
  0x1e   :  { %249 = vmatprep.mubr.f32.mxu1 %v110_v41  ;;  %579 = vmatprep.subr.bf16.mxu0 %v578_v35  ;;  %v263_v48 = vld [vmem:[%s968_s3 + $0x38] sm:$0xff]  ;;  %v624_v55 = vpack.c.bf16 %v262_v53, %v258_v52  ;;  %v269_v57 = vld [vmem:[%s968_s3 + $0x68] sm:$0xff]  ;;  %v264_v61 = vld [vmem:[%s968_s3 + $0x40] sm:$0xff] }
  0x1f   :  { %609 = vmatpush3.bf16.msra.mxu1 %v608_v34  ;;  %v622_v50 = vpack.c.bf16 %v263_v48, %v259_v46  ;;  %v267_v58 = vld [vmem:[%s968_s3 + $0x58] sm:$0xff]  ;;  %v618_v59 = vpack.c.bf16 %v269_v57, %v265_v56  ;;  %v268_v62 = vld [vmem:[%s968_s3 + $0x60] sm:$0xff]  ;;  %v266_v2 = vld [vmem:[%s968_s3 + $0x50] sm:$0xff] }
  0x20   :  { %611 = vmatprep.subr.bf16.mxu1 %v610_v38  ;;  %v271_v60 = vld [vmem:[%s968_s3 + $0x78] sm:$0xff]  ;;  %v620_v1 = vpack.c.bf16 %v268_v62, %v264_v61  ;;  %v270_v3 = vld [vmem:[%s968_s3 + $0x70] sm:$0xff]  ;;  %v477_v7 = vld [vmem:[%s967_s2] ss:$0 sm:$0xff]  ;;  %s660_s2 = smov [#allocation2]  }
  0x21   :  { %581 = vmatpush3.bf16.msra.mxu0 %v580_v42  ;;  %v626_v63 = vpack.c.bf16 %v271_v60, %v267_v58  ;;  %v628_v4 = vpack.c.bf16 %v270_v3, %v266_v2  ;;  %v272_v19 = vld [vmem:[%s969_s4] sm:$0xf]  ;;  %s469_s4 = sshll.u32 %s660_s2, 4  ;;  %s470_s4 = int_to_ptr.vmem [resolvable:$true] %s469_s4 }
  0x22   :  { %615 = vmatprep.subr.bf16.mxu0 %v614_v47  ;;  %v277_v22 = vrot.slane %v272_v19, %v276_v17  ;;  %v285_v23 = vrot.slane %v272_v19, %v284_v18  ;;  %v281_v24 = vrot.slane %v272_v19, %v280_v20  ;;  %v289_v25 = vrot.slane %v272_v19, %v288_v21  ;;  %s634_s29 = scalar_lea.vmem %s470_s4, 128  ;;  %p639_p1 = scmp.lt.s32.totalorder %s470_s4, %s470_s4 }
  0x23   :  { %613 = vmatpush3.bf16.msra.mxu1 %v612_v43  ;;  %p635_p0 = scmp.ne.s32.totalorder %s470_s4, %s634_s29  ;;  %p640_p2 = scmp.lt.s32.totalorder %s634_s29, %s634_s29 }
  0x24   :  { %180 = vmatmul.mubr.f32.vlgmr.msra.gmra.mrb[0].mxu0 %v101_v27  ;;  %623 = vmatprep.subr.bf16.mxu1 %v622_v50 }
  0x25   :  { %617 = vmatpush1.bf16.msra.mxu0 %v616_v54  ;;  %362 = vmatprep.mubr.f32.mxu0 %v659_v5  ;;  %p641_p3 = por %p640_p2, %p639_p1 }
  0x26   :  { %250 = vmatmul.mubr.f32.vlgmr.msra.gmra.mrb[0].mxu1 %v108_v33  ;;  %619 = vmatprep.subr.bf16.mxu0 %v618_v59 }
  0x27   :  { %625 = vmatpush1.bf16.msra.mxu1 %v624_v55  ;;  %433 = vmatprep.mubr.f32.mxu1 %v659_v5  ;;  %p642_p4 = pnand %p641_p3, %p635_p0 }
  0x28   :  { %627 = vmatprep.subr.bf16.mxu1 %v626_v63 }
  0x29   :  { %621 = vmatpush1.bf16.msra.mxu0 %v620_v1 }
  0x2b   :  { %629 = vmatpush1.bf16.msra.mxu1 %v628_v4 }
  0xf7   :  { %v512_v6 = vpop.f32.mrb[0].mxu0 }
  0xf8   :  { %v513_v8 = vpop.f32.mrb[1].mxu0 }
  0xf9   :  { %v547_v9 = vpop.f32.mrb[0].mxu1  ;;  %v514_v10 = vadd.f32 %v513_v8, %v512_v6 }
  0xfa   :  { %v548_v11 = vpop.f32.mrb[1].mxu1 }
  0xfb   :  { %v549_v12 = vadd.f32 %v548_v11, %v547_v9  ;;  %v182_v14 = vadd.f32 %v514_v10, %v477_v7 }
  0xfd   :  { %v252_v15 = vadd.f32 %v549_v12, %v182_v14 }
  0xff   :  { %v255_v16 = vmax.f32 %v252_v15, 0.0 }
 0x101   :  { %478 = vmatmul.mubr.msk.f32.vlgmr.msra.gmra.mrb[2].mxu0 %vm294_vm0, %v255_v16  ;;  %479 = vmatmul.mubr.msk.f32.vlgmr.msra.gmra.mrb[2].mxu1 %vm294_vm0, %v255_v16 }
 0x1d4   :  { %v364_v26 = vpop.f32.mrb[2].mxu0  ;;  %v435_v27 = vpop.f32.mrb[2].mxu1 }
 0x1d5   :  { %v365_v28 = vadd.f32 %v364_v26, %v277_v22  ;;  %v436_v29 = vadd.f32 %v435_v27, %v285_v23  ;;  %v366_v30 = vpop.f32.mrb[3].mxu0  ;;  %v437_v31 = vpop.f32.mrb[3].mxu1 }
 0x1d6   :  { %v367_v32 = vadd.f32 %v366_v30, %v281_v24  ;;  %v438_v33 = vadd.f32 %v437_v31, %v289_v25 }
 0x1d8   :  { %v444_v34 = vcombine.low %v365_v28, %v367_v32  ;;  %v445_v35 = vcombine.low %v436_v29, %v438_v33 }
 0x1da   :  { %v452_v36 = vrot.slane %v444_v34, %v844_v13  ;;  %v459_v0 = vrot.slane %v445_v35, %v844_v13 }
 0x1dc   :  { %v460_v37 = vcombine.low %v452_v36, %v459_v0 }
 0x1de   :  { %462 = vst [vmem:[#allocation2] sm:$0xff] %v460_v37 }
 0x1df   :  { %645 = shalt.err (!%p642_p4)
}
 0x1e0   :  { %s646_s7 = scalar_lea.hbm %s970_s5, 128 }
 0x1e1   :  { %p647_p5 = scmp.ne.s32.totalorder %s970_s5, %s646_s7  ;;  %p650_p6 = scmp.lt.u32.totalorder %s646_s7, %s970_s5 }
 0x1e3   :  { %p652_p7 = pnand %p650_p6, %p647_p5 }
 0x1e5   :  { %655 = shalt.err (!%p652_p7)
}
 0x1e6   :  { %472 = dma.vmem_to_hbm [thread:$0]  %s470_s4, 128, %s970_s5, [#allocation3]  }
 0x1e7   :  { %656 = dma.done.wait [#allocation3], 128  }
 0x1e8   :  { %657 = vsyncadd [#allocation3], 4294967168 }
 0x1e9   :  { %476 = vsyncpa [#allocation3], 1 }

</bundles_post_ra>
